<compile_context>
chip_gen: v7x
topology: tpu7x:2x2x1
jax: 0.10.0
libtpu: 0.0.40
codegen_flags: <defaults>
</compile_context>

<pallas_src>
import functools

import jax
import jax.numpy as jnp
from jax.experimental import pallas as pl
from jax.experimental.pallas import tpu as pltpu

_EPS = 1e-5


def _vmem_limit_bytes():
    """Per-generation scoped-VMEM limit: ~3/4 of physical, capped at 100 MiB."""
    try:
        cap = int(pltpu.get_tpu_info().vmem_capacity_bytes)
    except Exception:
        cap = 64 * 1024 * 1024          # conservative (v7x-sized) fallback
    return int(min(cap * 3 // 4, 100 * 1024 * 1024))


def _pick_images_per_step(n, per_image_bytes, vmem_limit):
    """Images per grid step: multi-MiB blocks, but keep >= min(n, 4) steps."""
    budget = max(vmem_limit // 4, per_image_bytes)   # headroom for 2x buffering
    cap = max(1, budget // max(per_image_bytes, 1))
    cap = min(cap, max(1, n // min(n, 4)))           # keep the grid "long enough"
    best = 1
    for d in range(1, int(min(cap, n)) + 1):
        if n % d == 0:
            best = d
    return best


# ----------------------------------------------------------------------------
# Stage 1 (per image slab, channel-major, HW on lanes):
#   relu(x * scale1 + shift1) -> 1x1 conv (bf16 MXU, f32 acc)
#   + merged BN2 partial moments (sum, sum of squares) in f32
#   + (aliased-concat path) pass x through into channels [0:Cin] of the
#     final buffer.
# ----------------------------------------------------------------------------
def bn_relu_conv1x1_kernel(x_ref, scale_ref, shift_ref, w_ref, *out_refs,
                           passthrough):
    if passthrough:
        o_ref, mom_ref, y_ref = out_refs
    else:
        o_ref, mom_ref = out_refs
        y_ref = None

    nb = x_ref.shape[0]
    cin = x_ref.shape[1]
    w1 = w_ref[...]                  # (Cinter, Cin) bf16  -- loaded once
    scale = scale_ref[...]           # (Cin, 1) f32
    shift = shift_ref[...]
    for b in range(nb):              # static; B is chosen small by the wrapper
        xb = x_ref[b]                                        # (Cin, HW) f32
        a = jnp.maximum(xb * scale + shift, 0.0)             # f32 VPU math
        out1 = jnp.dot(w1, a.astype(jnp.bfloat16),
                       preferred_element_type=jnp.float32)   # (Cinter, HW) f32
        o_ref[b] = out1.astype(o_ref.dtype)                  # bf16 store
        # f32 moments for BN2 batch stats (single-pass E[x^2] - E[x]^2).
        mom_ref[b, :, 0:1] = jnp.sum(out1, axis=1, keepdims=True)
        mom_ref[b, :, 1:2] = jnp.sum(out1 * out1, axis=1, keepdims=True)
        if passthrough:
            # Original x goes straight into the concat buffer; the growth
            # window is zero-filled and later overwritten by stage 2.
            y_ref[b, :cin, :] = xb
            y_ref[b, cin:, :] = jnp.zeros(
                (y_ref.shape[1] - cin, y_ref.shape[2]), y_ref.dtype)


# ----------------------------------------------------------------------------
# Stage 2 (per image slab):
#   relu(out1 * scale2 + shift2) -> 3x3 conv (padding=1) as ONE MXU matmul
#   over 9 masked lane-rotated taps; result written either into the growth
#   channel window of the aliased concat buffer, or (fallback) into a full
#   (Cin+G)-channel block together with an x pass-through.
# ----------------------------------------------------------------------------
def bn_relu_conv3x3_kernel(*refs, width, alias_out):
    if alias_out:
        o1_ref, scale_ref, shift_ref, w_ref, mask_ref, _y_hbm, y_ref = refs
        x_ref = None
    else:
        x_ref, o1_ref, scale_ref, shift_ref, w_ref, mask_ref, y_ref = refs

    nb = o1_ref.shape[0]
    hw = o1_ref.shape[-1]
    w_taps = w_ref[...]              # (G, 9*Cinter) bf16 -- loaded once
    scale = scale_ref[...]           # (Cinter, 1) f32
    shift = shift_ref[...]
    masks = mask_ref[...]            # (9, 1, HW) f32     -- loaded once
    for b in range(nb):
        a = jnp.maximum(o1_ref[b].astype(jnp.float32) * scale + shift, 0.0)
        taps = []
        for dy in range(3):
            for dx in range(3):
                t = dy * 3 + dx
                s = (dy - 1) * width + (dx - 1)   # flat source offset of tap
                if s == 0:
                    taps.append(a)                # centre tap: always in-image
                else:
                    # shifted[:, p] == a[:, p + s]; wrapped / out-of-image
                    # lanes are zeroed by the precomputed border mask.
                    shifted = pltpu.roll(a, (-s) % hw, axis=1)
                    taps.append(shifted * masks[t])
        stacked = jnp.concatenate(taps, axis=0).astype(jnp.bfloat16)
        out2 = jnp.dot(w_taps, stacked,
                       preferred_element_type=jnp.float32)   # (G, HW) f32
        if alias_out:
            y_ref[b] = out2
        else:
            cin = x_ref.shape[1]
            y_ref[b, :cin, :] = x_ref[b]
            y_ref[b, cin:, :] = out2


def _conv3x3_border_masks(H, W):
    """(9, 1, H*W) f32 mask: 1.0 where tap (dy, dx) reads an in-image pixel."""
    yy = jnp.arange(H, dtype=jnp.int32).reshape(H, 1)
    xx = jnp.arange(W, dtype=jnp.int32).reshape(1, W)
    rows = []
    for dy in range(3):
        for dx in range(3):
            valid = ((yy + (dy - 1) >= 0) & (yy + (dy - 1) < H) &
                     (xx + (dx - 1) >= 0) & (xx + (dx - 1) < W))
            rows.append(valid.reshape(1, H * W))
    return jnp.stack(rows, axis=0).astype(jnp.float32)


@jax.jit
def bottleneck_forward(x_nchw, params):
    """x: (N, nChannels, H, W) f32 -> (N, nChannels + growthRate, H, W) f32."""
    g1, b1, w1_oihw, g2, b2, w2_oihw = params
    N, Cin, H, W = x_nchw.shape
    Cinter = w1_oihw.shape[0]
    G = w2_oihw.shape[0]
    HW = H * W
    Cout = Cin + G

    x_flat = x_nchw.reshape(N, Cin, HW)            # free metadata reshape

    # ---- BN1 folded to per-channel (scale, shift): training-mode batch stats
    mean1 = jnp.mean(x_flat, axis=(0, 2))
    var1 = jnp.var(x_flat, axis=(0, 2))            # biased, like PyTorch train
    scale1 = (g1 / jnp.sqrt(var1 + _EPS)).astype(jnp.float32)
    shift1 = (b1 - mean1 * scale1).astype(jnp.float32)

    w1 = w1_oihw[:, :, 0, 0].astype(jnp.bfloat16)  # (Cinter, Cin)

    vmem_limit = _vmem_limit_bytes()
    per_image_bytes = HW * (4 * Cin + 2 * Cinter + 8 * Cout + 6 * 9 * Cinter)
    B = _pick_images_per_step(N, per_image_bytes, vmem_limit)
    steps = N // B

    cparams = pltpu.CompilerParams(
        dimension_semantics=("parallel",),         # both TensorCores on v7x
        vmem_limit_bytes=vmem_limit)

    # out2 can be written straight into the concat buffer only when the growth
    # window [Cin, Cin+G) is addressable as whole, 8-aligned channel blocks.
    alias_ok = (Cin % G == 0) and (G % 8 == 0)

    # ---- stage 1: BN1 + ReLU + 1x1 conv (+ BN2 moments, + x pass-through) ---
    s1_in_specs = [
        pl.BlockSpec((B, Cin, HW), lambda n: (n, 0, 0)),
        pl.BlockSpec((Cin, 1), lambda n: (0, 0)),
        pl.BlockSpec((Cin, 1), lambda n: (0, 0)),
        pl.BlockSpec((Cinter, Cin), lambda n: (0, 0)),
    ]
    s1_out_specs = [
        pl.BlockSpec((B, Cinter, HW), lambda n: (n, 0, 0)),
        pl.BlockSpec((B, Cinter, 2), lambda n: (n, 0, 0)),
    ]
    s1_out_shape = [
        jax.ShapeDtypeStruct((N, Cinter, HW), jnp.bfloat16),
        jax.ShapeDtypeStruct((N, Cinter, 2), jnp.float32),
    ]
    if alias_ok:
        s1_out_specs.append(pl.BlockSpec((B, Cout, HW), lambda n: (n, 0, 0)))
        s1_out_shape.append(jax.ShapeDtypeStruct((N, Cout, HW), jnp.float32))

    s1_outs = pl.pallas_call(
        functools.partial(bn_relu_conv1x1_kernel, passthrough=alias_ok),
        grid=(steps,),
        in_specs=s1_in_specs,
        out_specs=s1_out_specs,
        out_shape=s1_out_shape,
        compiler_params=cparams,
    )(x_flat, scale1.reshape(Cin, 1), shift1.reshape(Cin, 1), w1)

    if alias_ok:
        out1, mom, y_partial = s1_outs
    else:
        out1, mom = s1_outs
        y_partial = None

    # ---- BN2 folded (scale, shift) from the in-kernel partial moments -------
    cnt = jnp.float32(N * HW)
    msum = jnp.sum(mom, axis=0)                    # (Cinter, 2)
    mean2 = msum[:, 0] / cnt
    var2 = jnp.maximum(msum[:, 1] / cnt - mean2 * mean2, 0.0)  # biased variance
    scale2 = (g2 / jnp.sqrt(var2 + _EPS)).astype(jnp.float32)
    shift2 = (b2 - mean2 * scale2).astype(jnp.float32)

    # tap-major 3x3 weights flattened to (G, 9*Cinter); row t*Cinter + c
    # matches the in-kernel tap stacking order (t = dy*3 + dx).
    w2 = jnp.transpose(w2_oihw, (0, 2, 3, 1)).reshape(G, 9 * Cinter)
    w2 = w2.astype(jnp.bfloat16)
    masks = _conv3x3_border_masks(H, W)            # (9, 1, HW) f32

    kernel2 = functools.partial(bn_relu_conv3x3_kernel,
                                width=W, alias_out=alias_ok)
    common_in_specs = [
        pl.BlockSpec((B, Cinter, HW), lambda n: (n, 0, 0)),
        pl.BlockSpec((Cinter, 1), lambda n: (0, 0)),
        pl.BlockSpec((Cinter, 1), lambda n: (0, 0)),
        pl.BlockSpec((G, 9 * Cinter), lambda n: (0, 0)),
        pl.BlockSpec((9, 1, HW), lambda n: (0, 0, 0)),
    ]
    sc2 = scale2.reshape(Cinter, 1)
    sh2 = shift2.reshape(Cinter, 1)

    if alias_ok:
        cblk = Cin // G      # growth window = channel block index Cin // G
        y = pl.pallas_call(
            kernel2,
            grid=(steps,),
            in_specs=common_in_specs + [pl.BlockSpec(memory_space=pl.ANY)],
            out_specs=pl.BlockSpec((B, G, HW), lambda n: (n, cblk, 0)),
            out_shape=jax.ShapeDtypeStruct((N, Cout, HW), jnp.float32),
            input_output_aliases={5: 0},           # write into stage-1's buffer
            compiler_params=cparams,
        )(out1, sc2, sh2, w2, masks, y_partial)
    else:
        # TODO(synk): an Element-offset out_spec would drop this x re-read for
        # channel counts where the growth window is not block-addressable.
        y = pl.pallas_call(
            kernel2,
            grid=(steps,),
            in_specs=[pl.BlockSpec((B, Cin, HW), lambda n: (n, 0, 0))]
                     + common_in_specs,
            out_specs=pl.BlockSpec((B, Cout, HW), lambda n: (n, 0, 0)),
            out_shape=jax.ShapeDtypeStruct((N, Cout, HW), jnp.float32),
            compiler_params=cparams,
        )(x_flat, out1, sc2, sh2, w2, masks)

    return y.reshape(N, Cout, H, W)                # free metadata reshape


def reference_forward(x, params, eps=_EPS):
    """Pure-JAX f32 reference mirroring the PyTorch module (training-mode BN)."""
    g1, b1, w1, g2, b2, w2 = params

    def bn(x, gamma, beta):
        m = jnp.mean(x, axis=(0, 2, 3), keepdims=True)
        v = jnp.var(x, axis=(0, 2, 3), keepdims=True)
        return (x - m) / jnp.sqrt(v + eps) * gamma.reshape(1, -1, 1, 1) \
               + beta.reshape(1, -1, 1, 1)

    dn = ("NCHW", "OIHW", "NCHW")
    h = jax.nn.relu(bn(x, g1, b1))
    o1 = jax.lax.conv_general_dilated(h, w1, (1, 1), "VALID",
                                      dimension_numbers=dn)
    h2 = jax.nn.relu(bn(o1, g2, b2))
    o2 = jax.lax.conv_general_dilated(h2, w2, (1, 1), [(1, 1), (1, 1)],
                                      dimension_numbers=dn)
    return jnp.concatenate([x, o2], axis=1)


if __name__ == "__main__":
    # Module config: nChannels=16, growthRate=8 -> interChannels=32.
    nChannels, growthRate = 16, 8
    interChannels = 4 * growthRate
    N, H, W = 2, 16, 16

    key = jax.random.PRNGKey(0)
    kx, k1, k2, kg1, kb1, kg2, kb2 = jax.random.split(key, 7)

    x = jax.random.normal(kx, (N, nChannels, H, W), dtype=jnp.float32)

    # Deterministic synthetic parameters (shapes from the module __init__).
    w1 = 0.1 * jax.random.normal(k1, (interChannels, nChannels, 1, 1),
                                 jnp.float32)
    w2 = 0.1 * jax.random.normal(k2, (growthRate, interChannels, 3, 3),
                                 jnp.float32)
    gamma1 = 1.0 + 0.1 * jax.random.normal(kg1, (nChannels,), jnp.float32)
    beta1 = 0.1 * jax.random.normal(kb1, (nChannels,), jnp.float32)
    gamma2 = 1.0 + 0.1 * jax.random.normal(kg2, (interChannels,), jnp.float32)
    beta2 = 0.1 * jax.random.normal(kb2, (interChannels,), jnp.float32)

    params = (gamma1, beta1, w1, gamma2, beta2, w2)

    out = jax.block_until_ready(bottleneck_forward(x, params))
    ref = jax.block_until_ready(reference_forward(x, params))

    assert out.shape == (N, nChannels + growthRate, H, W), out.shape
    # x is passed through bit-exactly; the growth channels carry bf16 matmul /
    # bf16-intermediate rounding relative to the f32 reference.
    max_err = float(jnp.max(jnp.abs(out - ref)))
    assert jnp.allclose(out, ref, atol=1e-1, rtol=1e-1), max_err

    print("KERNEL_OK")
</pallas_src>

<mosaic_0001>
module attributes {stable_mosaic.version = 11 : i64} {
  func.func @bn_relu_conv1x1_kernel(%arg0: i32, %arg1: memref<1x16x256xf32, #tpu.memory_space<vmem>>, %arg2: memref<16x1xf32, #tpu.memory_space<vmem>>, %arg3: memref<16x1xf32, #tpu.memory_space<vmem>>, %arg4: memref<32x16xbf16, #tpu.memory_space<vmem>>, %arg5: memref<1x32x256xbf16, #tpu.memory_space<vmem>>, %arg6: memref<1x32x2xf32, #tpu.memory_space<vmem>>, %arg7: memref<1x24x256xf32, #tpu.memory_space<vmem>>) attributes {dimension_semantics = [#tpu.dimension_semantics<parallel>], iteration_bounds = array<i64: 2>, scalar_prefetch = 0 : i64, scratch_operands = 0 : i64, tpu.core_type = #tpu.core_type<tc>, window_params = [{transform_indices = @transform_0, window_bounds = array<i64: 1, 16, 256>}, {pipeline_mode = #tpu.pipeline_mode<synchronous>, transform_indices = @transform_1, window_bounds = array<i64: 16, 1>}, {pipeline_mode = #tpu.pipeline_mode<synchronous>, transform_indices = @transform_2, window_bounds = array<i64: 16, 1>}, {pipeline_mode = #tpu.pipeline_mode<synchronous>, transform_indices = @transform_3, window_bounds = array<i64: 32, 16>}, {transform_indices = @transform_4, window_bounds = array<i64: 1, 32, 256>}, {transform_indices = @transform_5, window_bounds = array<i64: 1, 32, 2>}, {transform_indices = @transform_6, window_bounds = array<i64: 1, 24, 256>}]} {
    %c0 = arith.constant 0 : index
    %c0_0 = arith.constant 0 : index
    %0 = vector.load %arg4[%c0, %c0_0] : memref<32x16xbf16, #tpu.memory_space<vmem>>, vector<32x16xbf16>
    %c0_1 = arith.constant 0 : index
    %c0_2 = arith.constant 0 : index
    %1 = vector.load %arg2[%c0_1, %c0_2] : memref<16x1xf32, #tpu.memory_space<vmem>>, vector<16x1xf32>
    %c0_3 = arith.constant 0 : index
    %c0_4 = arith.constant 0 : index
    %2 = vector.load %arg3[%c0_3, %c0_4] : memref<16x1xf32, #tpu.memory_space<vmem>>, vector<16x1xf32>
    %c0_5 = arith.constant 0 : index
    %c0_6 = arith.constant 0 : index
    %c0_7 = arith.constant 0 : index
    %3 = vector.load %arg1[%c0_5, %c0_6, %c0_7] : memref<1x16x256xf32, #tpu.memory_space<vmem>>, vector<1x16x256xf32>
    %4 = vector.shape_cast %3 : vector<1x16x256xf32> to vector<16x256xf32>
    %5 = vector.broadcast %1 : vector<16x1xf32> to vector<16x256xf32>
    %6 = arith.mulf %4, %5 : vector<16x256xf32>
    %7 = vector.broadcast %2 : vector<16x1xf32> to vector<16x256xf32>
    %8 = arith.addf %6, %7 : vector<16x256xf32>
    %cst = arith.constant 0.000000e+00 : f32
    %9 = vector.broadcast %cst : f32 to vector<16x256xf32>
    %10 = arith.maximumf %8, %9 : vector<16x256xf32>
    %11 = arith.truncf %10 : vector<16x256xf32> to vector<16x256xbf16>
    %cst_8 = arith.constant dense<0.000000e+00> : vector<32x256xf32>
    %12 = tpu.matmul %0, %11, %cst_8 {dimension_numbers = #tpu.dot_dimension_numbers<[1], [0], [0], [1], [0, 0, 1, 1], [], []>} : vector<32x16xbf16>, vector<16x256xbf16>, vector<32x256xf32> -> vector<32x256xf32>
    %13 = arith.truncf %12 : vector<32x256xf32> to vector<32x256xbf16>
    %c0_9 = arith.constant 0 : index
    %c0_10 = arith.constant 0 : index
    %c0_11 = arith.constant 0 : index
    %14 = vector.load %arg5[%c0_9, %c0_10, %c0_11] : memref<1x32x256xbf16, #tpu.memory_space<vmem>>, vector<1x32x256xbf16>
    %15 = vector.shape_cast %14 : vector<1x32x256xbf16> to vector<32x256xbf16>
    %16 = vector.shape_cast %13 : vector<32x256xbf16> to vector<1x32x256xbf16>
    tpu.vector_store %arg5[%c0_9, %c0_10, %c0_11], %16 {strides = array<i32>} : memref<1x32x256xbf16, #tpu.memory_space<vmem>>, vector<1x32x256xbf16>,
    %cst_12 = arith.constant dense<0.000000e+00> : vector<32xf32>
    %17 = vector.multi_reduction <add>, %12, %cst_12 [1] : vector<32x256xf32> to vector<32xf32>
    %18 = vector.shape_cast %17 : vector<32xf32> to vector<32x1xf32>
    %c0_13 = arith.constant 0 : index
    %c0_14 = arith.constant 0 : index
    %c0_15 = arith.constant 0 : index
    %19 = vector.load %arg6[%c0_13, %c0_14, %c0_15] : memref<1x32x2xf32, #tpu.memory_space<vmem>>, vector<1x32x1xf32>
    %20 = vector.shape_cast %19 : vector<1x32x1xf32> to vector<32x1xf32>
    %21 = vector.shape_cast %18 : vector<32x1xf32> to vector<1x32x1xf32>
    tpu.vector_store %arg6[%c0_13, %c0_14, %c0_15], %21 {strides = array<i32>} : memref<1x32x2xf32, #tpu.memory_space<vmem>>, vector<1x32x1xf32>,
    %22 = arith.mulf %12, %12 : vector<32x256xf32>
    %cst_16 = arith.constant dense<0.000000e+00> : vector<32xf32>
    %23 = vector.multi_reduction <add>, %22, %cst_16 [1] : vector<32x256xf32> to vector<32xf32>
    %24 = vector.shape_cast %23 : vector<32xf32> to vector<32x1xf32>
    %c0_17 = arith.constant 0 : index
    %c0_18 = arith.constant 0 : index
    %c1 = arith.constant 1 : index
    %25 = vector.load %arg6[%c0_17, %c0_18, %c1] : memref<1x32x2xf32, #tpu.memory_space<vmem>>, vector<1x32x1xf32>
    %26 = vector.shape_cast %25 : vector<1x32x1xf32> to vector<32x1xf32>
    %27 = vector.shape_cast %24 : vector<32x1xf32> to vector<1x32x1xf32>
    tpu.vector_store %arg6[%c0_17, %c0_18, %c1], %27 {strides = array<i32>} : memref<1x32x2xf32, #tpu.memory_space<vmem>>, vector<1x32x1xf32>,
    %c0_19 = arith.constant 0 : index
    %c0_20 = arith.constant 0 : index
    %c0_21 = arith.constant 0 : index
    %28 = vector.load %arg7[%c0_19, %c0_20, %c0_21] : memref<1x24x256xf32, #tpu.memory_space<vmem>>, vector<1x16x256xf32>
    %29 = vector.shape_cast %28 : vector<1x16x256xf32> to vector<16x256xf32>
    %30 = vector.shape_cast %4 : vector<16x256xf32> to vector<1x16x256xf32>
    tpu.vector_store %arg7[%c0_19, %c0_20, %c0_21], %30 {strides = array<i32>} : memref<1x24x256xf32, #tpu.memory_space<vmem>>, vector<1x16x256xf32>,
    %cst_22 = arith.constant 0.000000e+00 : f32
    %31 = vector.broadcast %cst_22 : f32 to vector<8x256xf32>
    %c0_23 = arith.constant 0 : index
    %c16 = arith.constant 16 : index
    %c0_24 = arith.constant 0 : index
    %32 = vector.load %arg7[%c0_23, %c16, %c0_24] : memref<1x24x256xf32, #tpu.memory_space<vmem>>, vector<1x8x256xf32>
    %33 = vector.shape_cast %32 : vector<1x8x256xf32> to vector<8x256xf32>
    %34 = vector.shape_cast %31 : vector<8x256xf32> to vector<1x8x256xf32>
    tpu.vector_store %arg7[%c0_23, %c16, %c0_24], %34 {strides = array<i32>} : memref<1x24x256xf32, #tpu.memory_space<vmem>>, vector<1x8x256xf32>,
    return
  }
  func.func @transform_0(%arg0: i32) -> (i32, i32, i32) {
    %c0_i32 = arith.constant 0 : i32
    %c0_i32_0 = arith.constant 0 : i32
    %c0_i32_1 = arith.constant 0 : i32
    return %arg0, %c0_i32, %c0_i32_0 : i32, i32, i32
  }
  func.func @transform_1(%arg0: i32) -> (i32, i32) {
    %c0_i32 = arith.constant 0 : i32
    %c0_i32_0 = arith.constant 0 : i32
    %c0_i32_1 = arith.constant 0 : i32
    return %c0_i32, %c0_i32_0 : i32, i32
  }
  func.func @transform_2(%arg0: i32) -> (i32, i32) {
    %c0_i32 = arith.constant 0 : i32
    %c0_i32_0 = arith.constant 0 : i32
    %c0_i32_1 = arith.constant 0 : i32
    return %c0_i32, %c0_i32_0 : i32, i32
  }
  func.func @transform_3(%arg0: i32) -> (i32, i32) {
    %c0_i32 = arith.constant 0 : i32
    %c0_i32_0 = arith.constant 0 : i32
    %c0_i32_1 = arith.constant 0 : i32
    return %c0_i32, %c0_i32_0 : i32, i32
  }
  func.func @transform_4(%arg0: i32) -> (i32, i32, i32) {
    %c0_i32 = arith.constant 0 : i32
    %c0_i32_0 = arith.constant 0 : i32
    %c0_i32_1 = arith.constant 0 : i32
    return %arg0, %c0_i32, %c0_i32_0 : i32, i32, i32
  }
  func.func @transform_5(%arg0: i32) -> (i32, i32, i32) {
    %c0_i32 = arith.constant 0 : i32
    %c0_i32_0 = arith.constant 0 : i32
    %c0_i32_1 = arith.constant 0 : i32
    return %arg0, %c0_i32, %c0_i32_0 : i32, i32, i32
  }
  func.func @transform_6(%arg0: i32) -> (i32, i32, i32) {
    %c0_i32 = arith.constant 0 : i32
    %c0_i32_0 = arith.constant 0 : i32
    %c0_i32_1 = arith.constant 0 : i32
    return %arg0, %c0_i32, %c0_i32_0 : i32, i32, i32
  }
}

module attributes {stable_mosaic.version = 11 : i64} {
  func.func @bn_relu_conv3x3_kernel(%arg0: i32, %arg1: memref<1x32x256xbf16, #tpu.memory_space<vmem>>, %arg2: memref<32x1xf32, #tpu.memory_space<vmem>>, %arg3: memref<32x1xf32, #tpu.memory_space<vmem>>, %arg4: memref<8x288xbf16, #tpu.memory_space<vmem>>, %arg5: memref<9x1x256xf32, #tpu.memory_space<vmem>>, %arg6: memref<2x24x256xf32, #tpu.memory_space<any>>, %arg7: memref<1x8x256xf32, #tpu.memory_space<vmem>>) attributes {dimension_semantics = [#tpu.dimension_semantics<parallel>], iteration_bounds = array<i64: 2>, scalar_prefetch = 0 : i64, scratch_operands = 0 : i64, tpu.core_type = #tpu.core_type<tc>, window_params = [{transform_indices = @transform_0, window_bounds = array<i64: 1, 32, 256>}, {pipeline_mode = #tpu.pipeline_mode<synchronous>, transform_indices = @transform_1, window_bounds = array<i64: 32, 1>}, {pipeline_mode = #tpu.pipeline_mode<synchronous>, transform_indices = @transform_2, window_bounds = array<i64: 32, 1>}, {pipeline_mode = #tpu.pipeline_mode<synchronous>, transform_indices = @transform_3, window_bounds = array<i64: 8, 288>}, {pipeline_mode = #tpu.pipeline_mode<synchronous>, transform_indices = @transform_4, window_bounds = array<i64: 9, 1, 256>}, {}, {transform_indices = @transform_6, window_bounds = array<i64: 1, 8, 256>}]} {
    %c0 = arith.constant 0 : index
    %c0_0 = arith.constant 0 : index
    %0 = vector.load %arg4[%c0, %c0_0] : memref<8x288xbf16, #tpu.memory_space<vmem>>, vector<8x288xbf16>
    %c0_1 = arith.constant 0 : index
    %c0_2 = arith.constant 0 : index
    %1 = vector.load %arg2[%c0_1, %c0_2] : memref<32x1xf32, #tpu.memory_space<vmem>>, vector<32x1xf32>
    %c0_3 = arith.constant 0 : index
    %c0_4 = arith.constant 0 : index
    %2 = vector.load %arg3[%c0_3, %c0_4] : memref<32x1xf32, #tpu.memory_space<vmem>>, vector<32x1xf32>
    %c0_5 = arith.constant 0 : index
    %c0_6 = arith.constant 0 : index
    %c0_7 = arith.constant 0 : index
    %3 = vector.load %arg5[%c0_5, %c0_6, %c0_7] : memref<9x1x256xf32, #tpu.memory_space<vmem>>, vector<9x1x256xf32>
    %c0_8 = arith.constant 0 : index
    %c0_9 = arith.constant 0 : index
    %c0_10 = arith.constant 0 : index
    %4 = vector.load %arg1[%c0_8, %c0_9, %c0_10] : memref<1x32x256xbf16, #tpu.memory_space<vmem>>, vector<1x32x256xbf16>
    %5 = vector.shape_cast %4 : vector<1x32x256xbf16> to vector<32x256xbf16>
    %6 = arith.extf %5 : vector<32x256xbf16> to vector<32x256xf32>
    %7 = vector.broadcast %1 : vector<32x1xf32> to vector<32x256xf32>
    %8 = arith.mulf %6, %7 : vector<32x256xf32>
    %9 = vector.broadcast %2 : vector<32x1xf32> to vector<32x256xf32>
    %10 = arith.addf %8, %9 : vector<32x256xf32>
    %cst = arith.constant 0.000000e+00 : f32
    %11 = vector.broadcast %cst : f32 to vector<32x256xf32>
    %12 = arith.maximumf %10, %11 : vector<32x256xf32>
    %c17_i32 = arith.constant 17 : i32
    %13 = tpu.dynamic_rotate %12 by %c17_i32 dim 1 : vector<32x256xf32>, i32 -> vector<32x256xf32>
    %14 = vector.extract_strided_slice %3 {offsets = [0, 0, 0], sizes = [1, 1, 256], strides = [1, 1, 1]} : vector<9x1x256xf32> to vector<1x1x256xf32>
    %15 = vector.shape_cast %14 : vector<1x1x256xf32> to vector<1x256xf32>
    %16 = vector.broadcast %15 : vector<1x256xf32> to vector<32x256xf32>
    %17 = arith.mulf %13, %16 : vector<32x256xf32>
    %c16_i32 = arith.constant 16 : i32
    %18 = tpu.dynamic_rotate %12 by %c16_i32 dim 1 : vector<32x256xf32>, i32 -> vector<32x256xf32>
    %19 = vector.extract_strided_slice %3 {offsets = [1, 0, 0], sizes = [1, 1, 256], strides = [1, 1, 1]} : vector<9x1x256xf32> to vector<1x1x256xf32>
    %20 = vector.shape_cast %19 : vector<1x1x256xf32> to vector<1x256xf32>
    %21 = vector.broadcast %20 : vector<1x256xf32> to vector<32x256xf32>
    %22 = arith.mulf %18, %21 : vector<32x256xf32>
    %c15_i32 = arith.constant 15 : i32
    %23 = tpu.dynamic_rotate %12 by %c15_i32 dim 1 : vector<32x256xf32>, i32 -> vector<32x256xf32>
    %24 = vector.extract_strided_slice %3 {offsets = [2, 0, 0], sizes = [1, 1, 256], strides = [1, 1, 1]} : vector<9x1x256xf32> to vector<1x1x256xf32>
    %25 = vector.shape_cast %24 : vector<1x1x256xf32> to vector<1x256xf32>
    %26 = vector.broadcast %25 : vector<1x256xf32> to vector<32x256xf32>
    %27 = arith.mulf %23, %26 : vector<32x256xf32>
    %c1_i32 = arith.constant 1 : i32
    %28 = tpu.dynamic_rotate %12 by %c1_i32 dim 1 : vector<32x256xf32>, i32 -> vector<32x256xf32>
    %29 = vector.extract_strided_slice %3 {offsets = [3, 0, 0], sizes = [1, 1, 256], strides = [1, 1, 1]} : vector<9x1x256xf32> to vector<1x1x256xf32>
    %30 = vector.shape_cast %29 : vector<1x1x256xf32> to vector<1x256xf32>
    %31 = vector.broadcast %30 : vector<1x256xf32> to vector<32x256xf32>
    %32 = arith.mulf %28, %31 : vector<32x256xf32>
    %c255_i32 = arith.constant 255 : i32
    %33 = tpu.dynamic_rotate %12 by %c255_i32 dim 1 : vector<32x256xf32>, i32 -> vector<32x256xf32>
    %34 = vector.extract_strided_slice %3 {offsets = [5, 0, 0], sizes = [1, 1, 256], strides = [1, 1, 1]} : vector<9x1x256xf32> to vector<1x1x256xf32>
    %35 = vector.shape_cast %34 : vector<1x1x256xf32> to vector<1x256xf32>
    %36 = vector.broadcast %35 : vector<1x256xf32> to vector<32x256xf32>
    %37 = arith.mulf %33, %36 : vector<32x256xf32>
    %c241_i32 = arith.constant 241 : i32
    %38 = tpu.dynamic_rotate %12 by %c241_i32 dim 1 : vector<32x256xf32>, i32 -> vector<32x256xf32>
    %39 = vector.extract_strided_slice %3 {offsets = [6, 0, 0], sizes = [1, 1, 256], strides = [1, 1, 1]} : vector<9x1x256xf32> to vector<1x1x256xf32>
    %40 = vector.shape_cast %39 : vector<1x1x256xf32> to vector<1x256xf32>
    %41 = vector.broadcast %40 : vector<1x256xf32> to vector<32x256xf32>
    %42 = arith.mulf %38, %41 : vector<32x256xf32>
    %c240_i32 = arith.constant 240 : i32
    %43 = tpu.dynamic_rotate %12 by %c240_i32 dim 1 : vector<32x256xf32>, i32 -> vector<32x256xf32>
    %44 = vector.extract_strided_slice %3 {offsets = [7, 0, 0], sizes = [1, 1, 256], strides = [1, 1, 1]} : vector<9x1x256xf32> to vector<1x1x256xf32>
    %45 = vector.shape_cast %44 : vector<1x1x256xf32> to vector<1x256xf32>
    %46 = vector.broadcast %45 : vector<1x256xf32> to vector<32x256xf32>
    %47 = arith.mulf %43, %46 : vector<32x256xf32>
    %c239_i32 = arith.constant 239 : i32
    %48 = tpu.dynamic_rotate %12 by %c239_i32 dim 1 : vector<32x256xf32>, i32 -> vector<32x256xf32>
    %49 = vector.extract_strided_slice %3 {offsets = [8, 0, 0], sizes = [1, 1, 256], strides = [1, 1, 1]} : vector<9x1x256xf32> to vector<1x1x256xf32>
    %50 = vector.shape_cast %49 : vector<1x1x256xf32> to vector<1x256xf32>
    %51 = vector.broadcast %50 : vector<1x256xf32> to vector<32x256xf32>
    %52 = arith.mulf %48, %51 : vector<32x256xf32>
    %53 = tpu.concatenate %17, %22, %27, %32, %12, %37, %42, %47, %52 in 0 : vector<32x256xf32>, vector<32x256xf32>, vector<32x256xf32>, vector<32x256xf32>, vector<32x256xf32>, vector<32x256xf32>, vector<32x256xf32>, vector<32x256xf32>, vector<32x256xf32> -> vector<288x256xf32>
    %54 = arith.truncf %53 : vector<288x256xf32> to vector<288x256xbf16>
    %cst_11 = arith.constant dense<0.000000e+00> : vector<8x256xf32>
    %55 = tpu.matmul %0, %54, %cst_11 {dimension_numbers = #tpu.dot_dimension_numbers<[1], [0], [0], [1], [0, 0, 1, 1], [], []>} : vector<8x288xbf16>, vector<288x256xbf16>, vector<8x256xf32> -> vector<8x256xf32>
    %c0_12 = arith.constant 0 : index
    %c0_13 = arith.constant 0 : index
    %c0_14 = arith.constant 0 : index
    %56 = vector.load %arg7[%c0_12, %c0_13, %c0_14] : memref<1x8x256xf32, #tpu.memory_space<vmem>>, vector<1x8x256xf32>
    %57 = vector.shape_cast %56 : vector<1x8x256xf32> to vector<8x256xf32>
    %58 = vector.shape_cast %55 : vector<8x256xf32> to vector<1x8x256xf32>
    tpu.vector_store %arg7[%c0_12, %c0_13, %c0_14], %58 {strides = array<i32>} : memref<1x8x256xf32, #tpu.memory_space<vmem>>, vector<1x8x256xf32>,
    return
  }
  func.func @transform_0(%arg0: i32) -> (i32, i32, i32) {
    %c0_i32 = arith.constant 0 : i32
    %c0_i32_0 = arith.constant 0 : i32
    %c0_i32_1 = arith.constant 0 : i32
    return %arg0, %c0_i32, %c0_i32_0 : i32, i32, i32
  }
  func.func @transform_1(%arg0: i32) -> (i32, i32) {
    %c0_i32 = arith.constant 0 : i32
    %c0_i32_0 = arith.constant 0 : i32
    %c0_i32_1 = arith.constant 0 : i32
    return %c0_i32, %c0_i32_0 : i32, i32
  }
  func.func @transform_2(%arg0: i32) -> (i32, i32) {
    %c0_i32 = arith.constant 0 : i32
    %c0_i32_0 = arith.constant 0 : i32
    %c0_i32_1 = arith.constant 0 : i32
    return %c0_i32, %c0_i32_0 : i32, i32
  }
  func.func @transform_3(%arg0: i32) -> (i32, i32) {
    %c0_i32 = arith.constant 0 : i32
    %c0_i32_0 = arith.constant 0 : i32
    %c0_i32_1 = arith.constant 0 : i32
    return %c0_i32, %c0_i32_0 : i32, i32
  }
  func.func @transform_4(%arg0: i32) -> (i32, i32, i32) {
    %c0_i32 = arith.constant 0 : i32
    %c0_i32_0 = arith.constant 0 : i32
    %c0_i32_1 = arith.constant 0 : i32
    %c0_i32_2 = arith.constant 0 : i32
    return %c0_i32, %c0_i32_0, %c0_i32_1 : i32, i32, i32
  }
  func.func @transform_6(%arg0: i32) -> (i32, i32, i32) {
    %c2_i32 = arith.constant 2 : i32
    %c0_i32 = arith.constant 0 : i32
    %c0_i32_0 = arith.constant 0 : i32
    return %arg0, %c2_i32, %c0_i32 : i32, i32, i32
  }
}

</mosaic_0001>

<bundles_post_ra>
// kernel: bottleneck_forward.2
= control target key start
LH: loop header
LB: loop body
LE: loop exit
PB: predicated region body
PF: predicated region fallthrough
CT: control target
= control target key end

     0   :  { %s682_s21 = smov 0   ;;  %s728_s0 = inlined_call_operand.vmem [shape: f32[2,16,256], index: 0, kind: input, shape index: {}]   ;;  %s729_s1 = inlined_call_operand.vmem [shape: f32[16,1], index: 1, kind: input, shape index: {}]   ;;  %s730_s2 = inlined_call_operand.vmem [shape: f32[16,1], index: 2, kind: input, shape index: {}]   ;;  %s731_s3 = inlined_call_operand.vmem [shape: bf16[32,16], index: 3, kind: input, shape index: {}]   ;;  %s732_s4 = inlined_call_operand.vmem [shape: bf16[2,32,256], index: 4, kind: output, shape index: {0}]   ;;  %s733_s5 = inlined_call_operand.vmem [shape: f32[2,32,2], index: 5, kind: output, shape index: {1}]   ;;  %s734_s6 = inlined_call_operand.vmem [shape: f32[2,24,256], index: 6, kind: output, shape index: {2}]  }
   0x1 LB: > { %s591_s22 = sadd.s32 4294967295, %s643_s21   ;;  %p595_p0 = scmp.ge.s32.totalorder %s643_s21, 1  ;;  %s643_s21 = sphi %s682_s21, %s17_s21  }
   0x2   : > { %p217_p1 = scmp.lt.s32.totalorder %s643_s21, 3 }
   0x4   : > { %p218_p2 = pnand %p595_p0, %p217_p1 }
   0x5   : > { %v284_v0 = vld [vmem:[%s730_s2] sm:$0xff] (!%p218_p2)  ;;  %p257_p3 = scmp.lt.s32.totalorder (!%p218_p2), %s591_s22, 1  ;;  %v645_v2 = vmov (!%p218_p2), 0   ;;  %v285_v3 = vld [vmem:[%s730_s2 + $0x8] sm:$0xff] (!%p218_p2)  ;;  %v646_v8 = vmov (!%p218_p2), 0.0   ;;  %vm334_vm0 = vcmask (!%p218_p2), 130048  }
   0x6   : > { %221 = sbr.rel (%p218_p2) target bundleno = 525 (0x20d), region = 36  ;;  %v282_v1 = vld [vmem:[%s729_s1] sm:$0xff] (!%p218_p2)  ;;  %634 = vset.pattern.permute.xlu1 (!%p218_p2), %v645_v2  ;;  %633 = vset.pattern.permute.xlu0 (!%p218_p2), %v645_v2  ;;  %v283_v4 = vld [vmem:[%s729_s1 + $0x8] sm:$0xff] (!%p218_p2)  ;;  %vm434_vm1 = vcmask (!%p218_p2), 7168   ;;  %vm459_vm2 = vcmask (!%p218_p2), 15368  }
   0x7   : > { %306 = vperm.xlu1 (!%p218_p2), %634, %v284_v0   ;;  %292 = vperm.xlu0 (!%p218_p2), %633, %v282_v1   ;;  %v635_v28 = vld [vmem:[%s731_s3] sm:$0xff] (!%p218_p2)   ;;  %v636_v29 = vld [vmem:[%s731_s3 + $0x8] sm:$0xff] (!%p218_p2)  }
   0x8   : > { %373 = vmatprep.mubr.bf16.mxu0 (!%p218_p2), %v645_v2  ;;  %383 = vmatprep.mubr.bf16.mxu1 (!%p218_p2), %v645_v2 }
   0xb   : > { %311 = vperm.xlu1 (!%p218_p2), %634, %v285_v3   ;;  %297 = vperm.xlu0 (!%p218_p2), %633, %v283_v4  }
   0xd   : > { %s736_s22 = smov (!%p257_p3, %s591_s22), 1 }
   0xe   : > { %s702_s7 = sshll.u32 %s736_s22, 5  ;;  %s622_s8 = smul.u32 48, %s736_s22 }
   0xf   : > { %s261_s11 = scalar_lea.vmem %s728_s0, %s702_s7  ;;  %s266_s22 = scalar_lea.vmem %s732_s4, %s702_s7 }
  0x10   : > { %s276_s14 = scalar_lea.vmem %s734_s6, %s622_s8  ;;  %v286_v5 = vld [vmem:[%s261_s11] sm:$0xff]  ;;  %v287_v6 = vld [vmem:[%s261_s11 + $0x8] sm:$0xff]  ;;  %v288_v7 = vld [vmem:[%s261_s11 + $0x10] sm:$0xff]  ;;  %s271_s25 = scalar_lea.vmem %s733_s5, %s702_s7 }
  0x11   : > { %464 = vst [vmem:[%s276_s14] sm:$0xff] %v286_v5  ;;  %465 = vst [vmem:[%s276_s14 + $0x8] sm:$0xff] %v287_v6  ;;  %v289_v9 = vld [vmem:[%s261_s11 + $0x18] sm:$0xff] }
  0x12   : > { %468 = vst [vmem:[%s276_s14 + $0x20] sm:$0xff] %v646_v8  ;;  %469 = vst [vmem:[%s276_s14 + $0x28] sm:$0xff] %v646_v8 }
  0x13   : > { %466 = vst [vmem:[%s276_s14 + $0x10] sm:$0xff] %v288_v7  ;;  %467 = vst [vmem:[%s276_s14 + $0x18] sm:$0xff] %v289_v9 }
  0x86   : > { %v307_v10 = vpop.permute.xlu1 %306  ;;  %v293_v11 = vpop.permute.xlu0 %292 }
  0x87   : > { %v300_v12 = vmul.f32 %v293_v11, %v286_v5  ;;  %v301_v13 = vmul.f32 %v293_v11, %v287_v6 }
  0x89   : > { %v314_v15 = vadd.f32 %v307_v10, %v300_v12  ;;  %v315_v16 = vadd.f32 %v307_v10, %v301_v13 }
  0x8a   : > { %v298_v14 = vpop.permute.xlu0 %297  ;;  %v312_v19 = vpop.permute.xlu1 %311 }
  0x8b   : > { %v302_v17 = vmul.f32 %v298_v14, %v288_v7  ;;  %v303_v18 = vmul.f32 %v298_v14, %v289_v9  ;;  %v319_v22 = vmax.f32 %v315_v16, 0.0  ;;  %v318_v24 = vmax.f32 %v314_v15, 0.0 }
  0x8d   : > { %v316_v20 = vadd.f32 %v312_v19, %v302_v17  ;;  %v317_v21 = vadd.f32 %v312_v19, %v303_v18 }
  0x8f   : > { %v321_v23 = vmax.f32 %v317_v21, 0.0  ;;  %v320_v25 = vmax.f32 %v316_v20, 0.0 }
  0x91   : > { %v323_v26 = vpack.c.bf16 %v321_v23, %v319_v22  ;;  %v322_v27 = vpack.c.bf16 %v320_v25, %v318_v24 }
  0x93   : > { %341 = vmatprep.subr.bf16.mxu0 %v323_v26  ;;  %620 = vmatprep.subr.bf16.mxu1 %v323_v26 }
  0x94   : > { %342 = vmatpush1.bf16.msra.mxu0 %v322_v27  ;;  %621 = vmatpush1.bf16.msra.mxu1 %v322_v27 }
  0x97   : > { %605 = vmatmul.mubr.msk.bf16.vlgmr.msra.gmra.mrb[0].mxu0 %vm334_vm0, %v635_v28  ;;  %606 = vmatmul.mubr.msk.bf16.vlgmr.msra.gmra.mrb[0].mxu1 %vm334_vm0, %v636_v29 }
 0x16a   : > { %v375_v30 = vpop.f32.mrb[0].mxu0  ;;  %v385_v31 = vpop.f32.mrb[0].mxu1 }
 0x16b   : > { %v377_v32 = vpop.f32.mrb[1].mxu0  ;;  %v387_v33 = vpop.f32.mrb[1].mxu1  ;;  %v439_v34 = vmul.f32 %v375_v30, %v375_v30  ;;  %v443_v35 = vmul.f32 %v385_v31, %v385_v31 }
 0x16c   : > { %v616_v36 = vpack.c.bf16 %v377_v32, %v375_v30  ;;  %v379_v37 = vpop.f32.mrb[2].mxu0  ;;  %v618_v38 = vpack.c.bf16 %v387_v33, %v385_v31  ;;  %v389_v39 = vpop.f32.mrb[2].mxu1  ;;  %v422_v40 = vadd.f32 %v377_v32, %v375_v30  ;;  %v428_v41 = vadd.f32 %v387_v33, %v385_v31 }
 0x16d   : > { %v381_v42 = vpop.f32.mrb[3].mxu0  ;;  %v391_v43 = vpop.f32.mrb[3].mxu1  ;;  %v440_v44 = vmul.f32 %v377_v32, %v377_v32  ;;  %v444_v45 = vmul.f32 %v387_v33, %v387_v33  ;;  %v441_v46 = vmul.f32 %v379_v37, %v379_v37  ;;  %v445_v47 = vmul.f32 %v389_v39, %v389_v39 }
 0x16e   : > { %418 = vst [vmem:[%s266_s22] sm:$0xff] %v616_v36  ;;  %420 = vst [vmem:[%s266_s22 + $0x10] sm:$0xff] %v618_v38  ;;  %v617_v48 = vpack.c.bf16 %v381_v42, %v379_v37  ;;  %v442_v49 = vmul.f32 %v381_v42, %v381_v42  ;;  %v619_v50 = vpack.c.bf16 %v391_v43, %v389_v39  ;;  %423 = vadd.xlane.f32.xlu0 %v422_v40 }
 0x16f   : > { %v446_v51 = vmul.f32 %v391_v43, %v391_v43  ;;  %v425_v52 = vadd.f32 %v381_v42, %v379_v37  ;;  %v447_v53 = vadd.f32 %v440_v44, %v439_v34  ;;  %v431_v54 = vadd.f32 %v391_v43, %v389_v39 }
 0x170   : > { %v453_v55 = vadd.f32 %v444_v45, %v443_v35  ;;  %419 = vst [vmem:[%s266_s22 + $0x8] sm:$0xff] %v617_v48  ;;  %421 = vst [vmem:[%s266_s22 + $0x18] sm:$0xff] %v619_v50  ;;  %v450_v56 = vadd.f32 %v442_v49, %v441_v46 }
 0x171   : > { %v456_v57 = vadd.f32 %v446_v51, %v445_v47  ;;  %426 = vadd.xlane.f32.xlu1 %v425_v52 }
 0x172   : > { %429 = vadd.xlane.f32.xlu0 %v428_v41 }
 0x175   : > { %448 = vadd.xlane.f32.xlu1 %v447_v53 }
 0x176   : > { %432 = vadd.xlane.f32.xlu0 %v431_v54 }
 0x179   : > { %454 = vadd.xlane.f32.xlu1 %v453_v55 }
 0x17a   : > { %451 = vadd.xlane.f32.xlu0 %v450_v56 }
 0x17e   : > { %457 = vadd.xlane.f32.xlu0 %v456_v57 }
 0x1fb   : > { %v424_v58 = vpop.xlane.xlu0 %423 }
 0x1fc   : > { %435 = vst.msk [vmem:[%s271_s25] sm:$0xff] %vm434_vm1, %v424_v58 }
 0x1fe   : > { %v427_v59 = vpop.xlane.xlu1 %426 }
 0x1ff   : > { %436 = vst.msk [vmem:[%s271_s25 + $0x8] sm:$0xff] %vm434_vm1, %v427_v59  ;;  %v430_v60 = vpop.xlane.xlu0 %429 }
 0x200   : > { %437 = vst.msk [vmem:[%s271_s25 + $0x10] sm:$0xff] %vm434_vm1, %v430_v60 }
 0x202   : > { %v449_v61 = vpop.xlane.xlu1 %448 }
 0x203   : > { %460 = vst.msk [vmem:[%s271_s25] sm:$0xff] %vm459_vm2, %v449_v61  ;;  %v433_v62 = vpop.xlane.xlu0 %432 }
 0x204   : > { %438 = vst.msk [vmem:[%s271_s25 + $0x18] sm:$0xff] %vm434_vm1, %v433_v62 }
 0x206   : > { %v455_v63 = vpop.xlane.xlu1 %454 }
 0x207   : > { %462 = vst.msk [vmem:[%s271_s25 + $0x10] sm:$0xff] %vm459_vm2, %v455_v63  ;;  %v452_v0 = vpop.xlane.xlu0 %451 }
 0x208   : > { %461 = vst.msk [vmem:[%s271_s25 + $0x8] sm:$0xff] %vm459_vm2, %v452_v0 }
 0x20b   : > { %v458_v1 = vpop.xlane.xlu0 %457 }
 0x20c   : > { %463 = vst.msk [vmem:[%s271_s25 + $0x18] sm:$0xff] %vm459_vm2, %v458_v1 }
 0x20d PF: > { %s17_s21 = sadd.s32 1, %s643_s21  }
 0x20e   : > { %p14_p4 = scmp.ge.s32.totalorder %s17_s21, 4  }
 0x210   :  { %16 = sbr.rel (!%p14_p4) target bundleno = 1 (0x1), region = 90 }

// kernel: bottleneck_forward.3
= control target key start
LH: loop header
LB: loop body
LE: loop exit
PB: predicated region body
PF: predicated region fallthrough
CT: control target
= control target key end

     0   :  { %s969_s21 = smov 0   ;;  %s1312_s0 = inlined_call_operand.vmem [shape: bf16[2,32,256], index: 0, kind: input, shape index: {}]   ;;  %s1313_s1 = inlined_call_operand.vmem [shape: f32[32,1], index: 1, kind: input, shape index: {}]   ;;  %s1314_s2 = inlined_call_operand.vmem [shape: f32[32,1], index: 2, kind: input, shape index: {}]   ;;  %s1315_s3 = inlined_call_operand.vmem [shape: bf16[8,288], index: 3, kind: input, shape index: {}]   ;;  %s1316_s4 = inlined_call_operand.vmem [shape: f32[9,1,256], index: 4, kind: input, shape index: {}]   ;;  %s1317_s5 = inlined_call_operand.vmem [shape: f32[2,24,256], index: 5, kind: input, shape index: {}, may-alias: {5,6}]   ;;  %s1318_s6 = inlined_call_operand.vmem [shape: f32[2,24,256], index: 6, kind: output, shape index: {}, may-alias: {5,6}]  }
   0x1 LB: > { %s876_s22 = sadd.s32 4294967295, %s923_s21   ;;  %p880_p0 = scmp.ge.s32.totalorder %s923_s21, 1  ;;  %s923_s21 = sphi %s969_s21, %s16_s21  }
   0x2   : > { %p188_p1 = scmp.lt.s32.totalorder %s923_s21, 3 }
   0x4   : > { %p189_p2 = pnand %p880_p0, %p188_p1 }
   0x5   : > { %v235_v0 = vld [vmem:[%s1314_s2] sm:$0xff] (!%p189_p2)  ;;  %v925_v2 = vmov (!%p189_p2), 0   ;;  %v236_v3 = vld [vmem:[%s1314_s2 + $0x8] sm:$0xff] (!%p189_p2)  ;;  %v234_v5 = vld [vmem:[%s1313_s1 + $0x18] sm:$0xff] (!%p189_p2)  ;;  %p217_p3 = scmp.lt.s32.totalorder (!%p189_p2), %s876_s22, 1  ;;  %s926_s18 = smov (!%p189_p2), 17   ;;  %v339_v53 = vlaneseq (!%p189_p2) }
   0x6   : > { %192 = sbr.rel (%p189_p2) target bundleno = 609 (0x261), region = 40  ;;  %v231_v1 = vld [vmem:[%s1313_s1] sm:$0xff] (!%p189_p2)  ;;  %913 = vset.pattern.permute.xlu1 (!%p189_p2), %v925_v2  ;;  %912 = vset.pattern.permute.xlu0 (!%p189_p2), %v925_v2  ;;  %v232_v4 = vld [vmem:[%s1313_s1 + $0x8] sm:$0xff] (!%p189_p2)  ;;  %v233_v6 = vld [vmem:[%s1313_s1 + $0x10] sm:$0xff] (!%p189_p2)  ;;  %s927_s19 = smov (!%p189_p2), 16   ;;  %vm723_vm8 = vcmask (!%p189_p2), 261120  }
   0x7   : > { %289 = vperm.xlu1 (!%p189_p2), %913, %v235_v0   ;;  %261 = vperm.xlu0 (!%p189_p2), %912, %v231_v1   ;;  %v238_v7 = vld [vmem:[%s1314_s2 + $0x18] sm:$0xff] (!%p189_p2)  ;;  %v237_v8 = vld [vmem:[%s1314_s2 + $0x10] sm:$0xff] (!%p189_p2)  ;;  %s928_s20 = smov (!%p189_p2), 15   ;;  %s929_s23 = smov (!%p189_p2), 1   ;;  %v352_v54 = vshrl.u32 (!%p189_p2), %v339_v53, 7  ;;  %v1092_v56 = vand.u32 (!%p189_p2), 127, %v339_v53 }
   0x8   : > { %800 = vmatprep.mubr.bf16.mxu0 (!%p189_p2), %v925_v2  ;;  %s930_s5 = smov (!%p189_p2), 127   ;;  %s931_s24 = smov (!%p189_p2), 113   ;;  %v1102_v59 = vld [vmem:[%s1315_s3] sm:$0xff] (!%p189_p2) }
   0x9   : > { %s932_s25 = smov (!%p189_p2), 112   ;;  %s933_s26 = smov (!%p189_p2), 111   ;;  %v1095_v57 = vsub.s32 (!%p189_p2), 0, %v352_v54  ;;  %v1097_v58 = vsub.s32 (!%p189_p2), 1, %v352_v54  ;;  %v239_v60 = vld [vmem:[%s1316_s4] sm:$0x3] (!%p189_p2)  ;;  %v885_v61 = vcombine.high (!%p189_p2), %v1102_v59, %v1102_v59 }
   0xa   : > { %vm341_vm0 = vcmp.lt.s32.totalorder (!%p189_p2), %v1092_v56, 17  ;;  %vm385_vm1 = vcmp.lt.s32.totalorder (!%p189_p2), %v1092_v56, 16  ;;  %vm429_vm2 = vcmp.lt.s32.totalorder (!%p189_p2), %v1092_v56, 15  ;;  %vm473_vm3 = vcmp.lt.s32.totalorder (!%p189_p2), %v1092_v56, 1 }
   0xb   : > { %294 = vperm.xlu1 (!%p189_p2), %913, %v236_v3   ;;  %266 = vperm.xlu0 (!%p189_p2), %912, %v232_v4   ;;  %v354_v0 = vrot.slane (!%p189_p2), %v239_v60, %v1095_v57  ;;  %v358_v1 = vrot.slane (!%p189_p2), %v239_v60, %v1097_v58  ;;  %vm517_vm4 = vcmp.lt.s32.totalorder (!%p189_p2), %v1092_v56, 127  ;;  %vm561_vm5 = vcmp.lt.s32.totalorder (!%p189_p2), %v1092_v56, 113 }
   0xc   : > { %759 = vmatprep.mubr.bf16.mxu1 (!%p189_p2), %v885_v61  ;;  %vm605_vm6 = vcmp.lt.s32.totalorder (!%p189_p2), %v1092_v56, 112  ;;  %vm649_vm7 = vcmp.lt.s32.totalorder (!%p189_p2), %v1092_v56, 111 }
   0xd   : > { %s1320_s22 = smov (!%p217_p3, %s876_s22), 1 }
   0xe   : > { %s892_s14 = sshll.u32 %s1320_s22, 5 }
   0xf   : > { %276 = vperm.xlu1 %913, %v234_v5   ;;  %271 = vperm.xlu0 %912, %v233_v6   ;;  %s221_s17 = scalar_lea.vmem %s1312_s0, %s892_s14 }
  0x10   : > { %v247_v9 = vld [vmem:[%s221_s17] sm:$0xff]  ;;  %v248_v12 = vld [vmem:[%s221_s17 + $0x8] sm:$0xff]  ;;  %v250_v22 = vld [vmem:[%s221_s17 + $0x18] sm:$0xff] }
  0x11   : > { %v251_v10 = vunpack.c.l.bf16 %v247_v9  ;;  %v252_v11 = vunpack.c.h.bf16 %v247_v9  ;;  %v253_v17 = vunpack.c.l.bf16 %v248_v12  ;;  %v254_v18 = vunpack.c.h.bf16 %v248_v12  ;;  %v249_v23 = vld [vmem:[%s221_s17 + $0x10] sm:$0xff] }
  0x12   : > { %v257_v29 = vunpack.c.l.bf16 %v250_v22  ;;  %v255_v30 = vunpack.c.l.bf16 %v249_v23  ;;  %v256_v36 = vunpack.c.h.bf16 %v249_v23  ;;  %v258_v37 = vunpack.c.h.bf16 %v250_v22 }
  0x13   : > { %304 = vperm.xlu1 %913, %v238_v7   ;;  %299 = vperm.xlu0 %912, %v237_v8  }
  0x86   : > { %v290_v13 = vpop.permute.xlu1 %289  ;;  %v262_v14 = vpop.permute.xlu0 %261 }
  0x87   : > { %v279_v15 = vmul.f32 %v262_v14, %v251_v10  ;;  %v280_v16 = vmul.f32 %v262_v14, %v252_v11 }
  0x89   : > { %v307_v19 = vadd.f32 %v290_v13, %v279_v15  ;;  %v308_v24 = vadd.f32 %v290_v13, %v280_v16 }
  0x8a   : > { %v295_v20 = vpop.permute.xlu1 %294  ;;  %v267_v21 = vpop.permute.xlu0 %266 }
  0x8b   : > { %v1007_v25 = vmax.f32 %v307_v19, 0.0  ;;  %v281_v26 = vmul.f32 %v267_v21, %v253_v17  ;;  %v282_v27 = vmul.f32 %v267_v21, %v254_v18  ;;  %v1011_v33 = vmax.f32 %v308_v24, 0.0 }
  0x8d   : > { %v309_v28 = vadd.f32 %v295_v20, %v281_v26  ;;  %323 = vrot.lane.b32.xlu0 %v1007_v25, %s926_s18  ;;  %v310_v34 = vadd.f32 %v295_v20, %v282_v27  ;;  %v240_v27 = vld [vmem:[%s1316_s4 + $0x2] sm:$0x3] }
  0x8e   : > { %v277_v31 = vpop.permute.xlu1 %276  ;;  %v272_v32 = vpop.permute.xlu0 %271 }
  0x8f   : > { %v1013_v35 = vmax.f32 %v309_v28, 0.0  ;;  %v285_v38 = vmul.f32 %v277_v31, %v257_v29  ;;  %v283_v39 = vmul.f32 %v272_v32, %v255_v30  ;;  %v1019_v42 = vmax.f32 %v310_v34, 0.0 }
  0x90   : > { %v284_v43 = vmul.f32 %v272_v32, %v256_v36  ;;  %v286_v46 = vmul.f32 %v277_v31, %v258_v37  ;;  %v398_v31 = vrot.slane %v240_v27, %v1095_v57  ;;  %v402_v32 = vrot.slane %v240_v27, %v1097_v58 }
  0x91   : > { %325 = vrot.lane.b32.xlu1 %v1013_v35, %s926_s18  ;;  %331 = vrot.lane.b32.xlu0 %v1011_v33, %s926_s18 }
  0x92   : > { %v305_v40 = vpop.permute.xlu1 %304  ;;  %v300_v41 = vpop.permute.xlu0 %299 }
  0x93   : > { %v313_v44 = vadd.f32 %v305_v40, %v285_v38  ;;  %v311_v45 = vadd.f32 %v300_v41, %v283_v39  ;;  %v312_v47 = vadd.f32 %v300_v41, %v284_v43  ;;  %v314_v49 = vadd.f32 %v305_v40, %v286_v46 }
  0x95   : > { %v1021_v48 = vmax.f32 %v311_v45, 0.0  ;;  %333 = vrot.lane.b32.xlu1 %v1019_v42, %s926_s18  ;;  %v1025_v50 = vmax.f32 %v313_v44, 0.0  ;;  %v1029_v51 = vmax.f32 %v312_v47, 0.0  ;;  %v1033_v52 = vmax.f32 %v314_v49, 0.0 }
  0x97   : > { %327 = vrot.lane.b32.xlu0 %v1021_v48, %s926_s18 }
  0x99   : > { %329 = vrot.lane.b32.xlu1 %v1025_v50, %s926_s18 }
  0x9b   : > { %335 = vrot.lane.b32.xlu0 %v1029_v51, %s926_s18 }
  0x9d   : > { %337 = vrot.lane.b32.xlu1 %v1033_v52, %s926_s18 }
  0x9f   : > { %369 = vrot.lane.b32.xlu0 %v1007_v25, %s927_s19 }
  0xa1   : > { %371 = vrot.lane.b32.xlu1 %v1013_v35, %s927_s19 }
  0xa3   : > { %377 = vrot.lane.b32.xlu0 %v1011_v33, %s927_s19 }
  0xa5   : > { %379 = vrot.lane.b32.xlu1 %v1019_v42, %s927_s19 }
  0xa7   : > { %373 = vrot.lane.b32.xlu0 %v1021_v48, %s927_s19 }
  0xa9   : > { %375 = vrot.lane.b32.xlu1 %v1025_v50, %s927_s19 }
  0xab   : > { %381 = vrot.lane.b32.xlu0 %v1029_v51, %s927_s19 }
  0xad   : > { %383 = vrot.lane.b32.xlu1 %v1033_v52, %s927_s19 }
  0xaf   : > { %413 = vrot.lane.b32.xlu0 %v1007_v25, %s928_s20 }
  0xb1   : > { %415 = vrot.lane.b32.xlu1 %v1013_v35, %s928_s20 }
  0xb3   : > { %421 = vrot.lane.b32.xlu0 %v1011_v33, %s928_s20 }
  0xb5   : > { %423 = vrot.lane.b32.xlu1 %v1019_v42, %s928_s20 }
  0xb7   : > { %417 = vrot.lane.b32.xlu0 %v1021_v48, %s928_s20 }
  0xb9   : > { %419 = vrot.lane.b32.xlu1 %v1025_v50, %s928_s20 }
  0xbb   : > { %425 = vrot.lane.b32.xlu0 %v1029_v51, %s928_s20 }
  0xbd   : > { %427 = vrot.lane.b32.xlu1 %v1033_v52, %s928_s20 }
  0xbf   : > { %457 = vrot.lane.b32.xlu0 %v1007_v25, %s929_s23 }
  0xc1   : > { %459 = vrot.lane.b32.xlu1 %v1013_v35, %s929_s23 }
  0xc3   : > { %465 = vrot.lane.b32.xlu0 %v1011_v33, %s929_s23 }
  0xc5   : > { %467 = vrot.lane.b32.xlu1 %v1019_v42, %s929_s23 }
  0xc7   : > { %461 = vrot.lane.b32.xlu0 %v1021_v48, %s929_s23 }
  0xc9   : > { %463 = vrot.lane.b32.xlu1 %v1025_v50, %s929_s23 }
  0xcb   : > { %469 = vrot.lane.b32.xlu0 %v1029_v51, %s929_s23 }
  0xcd   : > { %471 = vrot.lane.b32.xlu1 %v1033_v52, %s929_s23 }
  0xcf   : > { %501 = vrot.lane.b32.xlu0 %v1007_v25, %s930_s5 }
  0xd1   : > { %503 = vrot.lane.b32.xlu1 %v1013_v35, %s930_s5 }
  0xd3   : > { %509 = vrot.lane.b32.xlu0 %v1011_v33, %s930_s5 }
  0xd5   : > { %511 = vrot.lane.b32.xlu1 %v1019_v42, %s930_s5 }
  0xd7   : > { %505 = vrot.lane.b32.xlu0 %v1021_v48, %s930_s5 }
  0xd9   : > { %507 = vrot.lane.b32.xlu1 %v1025_v50, %s930_s5 }
  0xdb   : > { %513 = vrot.lane.b32.xlu0 %v1029_v51, %s930_s5 }
  0xdd   : > { %515 = vrot.lane.b32.xlu1 %v1033_v52, %s930_s5 }
  0xdf   : > { %545 = vrot.lane.b32.xlu0 %v1007_v25, %s931_s24 }
  0xe1   : > { %547 = vrot.lane.b32.xlu1 %v1013_v35, %s931_s24 }
  0xe3   : > { %553 = vrot.lane.b32.xlu0 %v1011_v33, %s931_s24 }
  0xe5   : > { %555 = vrot.lane.b32.xlu1 %v1019_v42, %s931_s24 }
  0xe7   : > { %549 = vrot.lane.b32.xlu0 %v1021_v48, %s931_s24 }
  0xe9   : > { %551 = vrot.lane.b32.xlu1 %v1025_v50, %s931_s24 }
  0xeb   : > { %557 = vrot.lane.b32.xlu0 %v1029_v51, %s931_s24 }
  0xed   : > { %559 = vrot.lane.b32.xlu1 %v1033_v52, %s931_s24  ;;  %s883_s24 = smul.u32 48, %s1320_s22 }
  0xef   : > { %589 = vrot.lane.b32.xlu0 %v1007_v25, %s932_s25  ;;  %s846_s27 = scalar_lea.vmem %s1318_s6, %s883_s24 }
  0xf1   : > { %591 = vrot.lane.b32.xlu1 %v1013_v35, %s932_s25 }
  0xf3   : > { %597 = vrot.lane.b32.xlu0 %v1011_v33, %s932_s25 }
  0xf5   : > { %599 = vrot.lane.b32.xlu1 %v1019_v42, %s932_s25 }
  0xf7   : > { %633 = vrot.lane.b32.xlu0 %v1007_v25, %s933_s26 }
  0xf9   : > { %635 = vrot.lane.b32.xlu1 %v1013_v35, %s933_s26 }
  0xfb   : > { %641 = vrot.lane.b32.xlu0 %v1011_v33, %s933_s26 }
  0xfd   : > { %643 = vrot.lane.b32.xlu1 %v1019_v42, %s933_s26 }
  0xff   : > { %593 = vrot.lane.b32.xlu0 %v1021_v48, %s932_s25  ;;  %v324_v55 = vpop.permute.xlu0 %323 }
 0x101   : > { %595 = vrot.lane.b32.xlu1 %v1025_v50, %s932_s25 }
 0x103   : > { %v326_v62 = vpop.permute.xlu1 %325  ;;  %601 = vrot.lane.b32.xlu0 %v1029_v51, %s932_s25  ;;  %v332_v63 = vpop.permute.xlu0 %331 }
 0x104   : > { %v342_v2 = vsel %vm341_vm0, %v324_v55, %v332_v63  ;;  %v346_v3 = vsel %vm341_vm0, %v332_v63, %v324_v55 }
 0x105   : > { %603 = vrot.lane.b32.xlu1 %v1033_v52, %s932_s25  ;;  %v361_v7 = vmul.f32 %v354_v0, %v346_v3  ;;  %v362_v10 = vmul.f32 %v358_v1, %v342_v2 }
 0x107   : > { %v334_v4 = vpop.permute.xlu1 %333  ;;  %637 = vrot.lane.b32.xlu0 %v1021_v48, %s933_s26 }
 0x108   : > { %v343_v5 = vsel %vm341_vm0, %v326_v62, %v334_v4  ;;  %v347_v6 = vsel %vm341_vm0, %v334_v4, %v326_v62 }
 0x109   : > { %v363_v8 = vmul.f32 %v354_v0, %v347_v6  ;;  %639 = vrot.lane.b32.xlu1 %v1025_v50, %s933_s26  ;;  %v328_v9 = vpop.permute.xlu0 %327  ;;  %v364_v11 = vmul.f32 %v358_v1, %v343_v5  ;;  %v241_v5 = vld [vmem:[%s1316_s4 + $0x4] sm:$0x3] }
 0x10b   : > { %v330_v12 = vpop.permute.xlu1 %329  ;;  %645 = vrot.lane.b32.xlu0 %v1029_v51, %s933_s26  ;;  %v678_v13 = vpack.c.bf16 %v364_v11, %v362_v10  ;;  %v677_v14 = vpack.c.bf16 %v363_v8, %v361_v7  ;;  %v446_v10 = vrot.slane %v241_v5, %v1097_v58 }
 0x10d   : > { %647 = vrot.lane.b32.xlu1 %v1033_v52, %s933_s26  ;;  %727 = vmatprep.subr.bf16.mxu1 %v678_v13  ;;  %v336_v15 = vpop.permute.xlu0 %335 }
 0x10e   : > { %v344_v16 = vsel %vm341_vm0, %v328_v9, %v336_v15  ;;  %v348_v17 = vsel %vm341_vm0, %v336_v15, %v328_v9  ;;  %728 = vmatpush1.bf16.msra.mxu1 %v677_v14  ;;  %v442_v9 = vrot.slane %v241_v5, %v1095_v57 }
 0x10f   : > { %v338_v18 = vpop.permute.xlu1 %337  ;;  %v365_v21 = vmul.f32 %v354_v0, %v348_v17  ;;  %v366_v22 = vmul.f32 %v358_v1, %v344_v16 }
 0x110   : > { %v345_v19 = vsel %vm341_vm0, %v330_v12, %v338_v18  ;;  %v349_v20 = vsel %vm341_vm0, %v338_v18, %v330_v12 }
 0x111   : > { %v367_v23 = vmul.f32 %v354_v0, %v349_v20  ;;  %v368_v24 = vmul.f32 %v358_v1, %v345_v19  ;;  %v370_v26 = vpop.permute.xlu0 %369 }
 0x113   : > { %v372_v28 = vpop.permute.xlu1 %371  ;;  %v680_v29 = vpack.c.bf16 %v368_v24, %v366_v22  ;;  %v679_v30 = vpack.c.bf16 %v367_v23, %v365_v21 }
 0x115   : > { %729 = vmatprep.subr.bf16.mxu1 %v680_v29  ;;  %v378_v34 = vpop.permute.xlu0 %377 }
 0x116   : > { %v386_v36 = vsel %vm385_vm1, %v370_v26, %v378_v34  ;;  %v390_v37 = vsel %vm385_vm1, %v378_v34, %v370_v26  ;;  %730 = vmatpush1.bf16.msra.mxu1 %v679_v30 }
 0x117   : > { %v380_v38 = vpop.permute.xlu1 %379  ;;  %v405_v41 = vmul.f32 %v398_v31, %v390_v37  ;;  %v406_v43 = vmul.f32 %v402_v32, %v386_v36 }
 0x118   : > { %v387_v39 = vsel %vm385_vm1, %v372_v28, %v380_v38  ;;  %v391_v40 = vsel %vm385_vm1, %v380_v38, %v372_v28 }
 0x119   : > { %v407_v44 = vmul.f32 %v398_v31, %v391_v40  ;;  %v408_v45 = vmul.f32 %v402_v32, %v387_v39  ;;  %v374_v46 = vpop.permute.xlu0 %373  ;;  %v242_v39 = vld [vmem:[%s1316_s4 + $0x6] sm:$0x3] }
 0x11b   : > { %v376_v47 = vpop.permute.xlu1 %375  ;;  %v682_v49 = vpack.c.bf16 %v408_v45, %v406_v43  ;;  %v681_v53 = vpack.c.bf16 %v407_v44, %v405_v41  ;;  %v486_v44 = vrot.slane %v242_v39, %v1095_v57  ;;  %v490_v45 = vrot.slane %v242_v39, %v1097_v58 }
 0x11d   : > { %731 = vmatprep.subr.bf16.mxu1 %v682_v49  ;;  %v382_v54 = vpop.permute.xlu0 %381 }
 0x11e   : > { %v388_v55 = vsel %vm385_vm1, %v374_v46, %v382_v54  ;;  %v392_v60 = vsel %vm385_vm1, %v382_v54, %v374_v46  ;;  %732 = vmatpush1.bf16.msra.mxu1 %v681_v53 }
 0x11f   : > { %v384_v61 = vpop.permute.xlu1 %383  ;;  %v409_v0 = vmul.f32 %v398_v31, %v392_v60  ;;  %v410_v1 = vmul.f32 %v402_v32, %v388_v55 }
 0x120   : > { %v389_v62 = vsel %vm385_vm1, %v376_v47, %v384_v61  ;;  %v393_v63 = vsel %vm385_vm1, %v384_v61, %v376_v47 }
 0x121   : > { %v411_v2 = vmul.f32 %v398_v31, %v393_v63  ;;  %v412_v3 = vmul.f32 %v402_v32, %v389_v62  ;;  %v414_v4 = vpop.permute.xlu0 %413 }
 0x123   : > { %v416_v6 = vpop.permute.xlu1 %415  ;;  %v684_v7 = vpack.c.bf16 %v412_v3, %v410_v1  ;;  %v683_v8 = vpack.c.bf16 %v411_v2, %v409_v0 }
 0x125   : > { %733 = vmatprep.subr.bf16.mxu1 %v684_v7  ;;  %v422_v11 = vpop.permute.xlu0 %421 }
 0x126   : > { %v430_v12 = vsel %vm429_vm2, %v414_v4, %v422_v11  ;;  %v434_v13 = vsel %vm429_vm2, %v422_v11, %v414_v4  ;;  %734 = vmatpush1.bf16.msra.mxu1 %v683_v8 }
 0x127   : > { %v424_v14 = vpop.permute.xlu1 %423  ;;  %v449_v17 = vmul.f32 %v442_v9, %v434_v13  ;;  %v450_v18 = vmul.f32 %v446_v10, %v430_v12 }
 0x128   : > { %v431_v15 = vsel %vm429_vm2, %v416_v6, %v424_v14  ;;  %v435_v16 = vsel %vm429_vm2, %v424_v14, %v416_v6 }
 0x129   : > { %v451_v19 = vmul.f32 %v442_v9, %v435_v16  ;;  %v452_v20 = vmul.f32 %v446_v10, %v431_v15  ;;  %v418_v21 = vpop.permute.xlu0 %417 }
 0x12b   : > { %v420_v22 = vpop.permute.xlu1 %419  ;;  %v686_v23 = vpack.c.bf16 %v452_v20, %v450_v18  ;;  %v685_v24 = vpack.c.bf16 %v451_v19, %v449_v17  ;;  %v243_v18 = vld [vmem:[%s1316_s4 + $0xa] sm:$0x3]  ;;  %v694_v20 = vpack.c.bf16 %v1019_v42, %v1011_v33  ;;  %v696_v33 = vpack.c.bf16 %v1033_v52, %v1029_v51 }
 0x12c   : > { %v530_v42 = vrot.slane %v243_v18, %v1095_v57 }
 0x12d   : > { %735 = vmatprep.subr.bf16.mxu1 %v686_v23  ;;  %v426_v26 = vpop.permute.xlu0 %425 }
 0x12e   : > { %v432_v27 = vsel %vm429_vm2, %v418_v21, %v426_v26  ;;  %v436_v28 = vsel %vm429_vm2, %v426_v26, %v418_v21  ;;  %736 = vmatpush1.bf16.msra.mxu1 %v685_v24  ;;  %v534_v21 = vrot.slane %v243_v18, %v1097_v58  ;;  %v693_v26 = vpack.c.bf16 %v1013_v35, %v1007_v25 }
 0x12f   : > { %v428_v29 = vpop.permute.xlu1 %427  ;;  %v453_v32 = vmul.f32 %v442_v9, %v436_v28  ;;  %v454_v34 = vmul.f32 %v446_v10, %v432_v27  ;;  %v695_v25 = vpack.c.bf16 %v1025_v50, %v1021_v48 }
 0x130   : > { %v433_v30 = vsel %vm429_vm2, %v420_v22, %v428_v29  ;;  %v437_v31 = vsel %vm429_vm2, %v428_v29, %v420_v22 }
 0x131   : > { %v455_v36 = vmul.f32 %v442_v9, %v437_v31  ;;  %v456_v37 = vmul.f32 %v446_v10, %v433_v30  ;;  %v458_v38 = vpop.permute.xlu0 %457 }
 0x133   : > { %v460_v40 = vpop.permute.xlu1 %459  ;;  %v688_v41 = vpack.c.bf16 %v456_v37, %v454_v34  ;;  %v687_v43 = vpack.c.bf16 %v455_v36, %v453_v32 }
 0x135   : > { %737 = vmatprep.subr.bf16.mxu1 %v688_v41  ;;  %v466_v46 = vpop.permute.xlu0 %465 }
 0x136   : > { %v474_v47 = vsel %vm473_vm3, %v458_v38, %v466_v46  ;;  %v478_v49 = vsel %vm473_vm3, %v466_v46, %v458_v38  ;;  %738 = vmatpush1.bf16.msra.mxu1 %v687_v43  ;;  %v244_v46 = vld [vmem:[%s1316_s4 + $0xc] sm:$0x3] }
 0x137   : > { %v468_v53 = vpop.permute.xlu1 %467  ;;  %v493_v60 = vmul.f32 %v486_v44, %v478_v49  ;;  %v494_v61 = vmul.f32 %v490_v45, %v474_v47 }
 0x138   : > { %v475_v54 = vsel %vm473_vm3, %v460_v40, %v468_v53  ;;  %v479_v55 = vsel %vm473_vm3, %v468_v53, %v460_v40 }
 0x139   : > { %v495_v62 = vmul.f32 %v486_v44, %v479_v55  ;;  %v496_v63 = vmul.f32 %v490_v45, %v475_v54  ;;  %v462_v0 = vpop.permute.xlu0 %461  ;;  %v574_v54 = vrot.slane %v244_v46, %v1095_v57  ;;  %v578_v55 = vrot.slane %v244_v46, %v1097_v58 }
 0x13b   : > { %v464_v1 = vpop.permute.xlu1 %463  ;;  %v690_v2 = vpack.c.bf16 %v496_v63, %v494_v61  ;;  %v689_v3 = vpack.c.bf16 %v495_v62, %v493_v60 }
 0x13d   : > { %739 = vmatprep.subr.bf16.mxu1 %v690_v2  ;;  %v470_v4 = vpop.permute.xlu0 %469 }
 0x13e   : > { %v476_v5 = vsel %vm473_vm3, %v462_v0, %v470_v4  ;;  %v480_v6 = vsel %vm473_vm3, %v470_v4, %v462_v0  ;;  %740 = vmatpush1.bf16.msra.mxu1 %v689_v3 }
 0x13f   : > { %v472_v7 = vpop.permute.xlu1 %471  ;;  %v497_v10 = vmul.f32 %v486_v44, %v480_v6  ;;  %v498_v11 = vmul.f32 %v490_v45, %v476_v5 }
 0x140   : > { %v477_v8 = vsel %vm473_vm3, %v464_v1, %v472_v7  ;;  %v481_v9 = vsel %vm473_vm3, %v472_v7, %v464_v1 }
 0x141   : > { %v499_v12 = vmul.f32 %v486_v44, %v481_v9  ;;  %v500_v13 = vmul.f32 %v490_v45, %v477_v8  ;;  %v502_v14 = vpop.permute.xlu0 %501 }
 0x143   : > { %v504_v15 = vpop.permute.xlu1 %503  ;;  %v692_v16 = vpack.c.bf16 %v500_v13, %v498_v11  ;;  %v691_v17 = vpack.c.bf16 %v499_v12, %v497_v10 }
 0x145   : > { %741 = vmatprep.subr.bf16.mxu1 %v692_v16  ;;  %v510_v19 = vpop.permute.xlu0 %509 }
 0x146   : > { %742 = vmatpush1.bf16.msra.mxu1 %v691_v17  ;;  %v522_v23 = vsel %vm517_vm4, %v510_v19, %v502_v14  ;;  %v518_v30 = vsel %vm517_vm4, %v502_v14, %v510_v19 }
 0x147   : > { %v512_v22 = vpop.permute.xlu1 %511  ;;  %743 = vmatprep.subr.bf16.mxu1 %v694_v20  ;;  %v538_v31 = vmul.f32 %v534_v21, %v522_v23  ;;  %v537_v37 = vmul.f32 %v530_v42, %v518_v30 }
 0x148   : > { %v523_v24 = vsel %vm517_vm4, %v512_v22, %v504_v15  ;;  %v519_v27 = vsel %vm517_vm4, %v504_v15, %v512_v22 }
 0x149   : > { %v540_v28 = vmul.f32 %v534_v21, %v523_v24  ;;  %v506_v29 = vpop.permute.xlu0 %505  ;;  %v539_v34 = vmul.f32 %v530_v42, %v519_v27 }
 0x14a   : > { %744 = vmatpush1.bf16.msra.mxu1 %v693_v26 }
 0x14b   : > { %v508_v32 = vpop.permute.xlu1 %507  ;;  %745 = vmatprep.subr.bf16.mxu1 %v696_v33  ;;  %v698_v36 = vpack.c.bf16 %v540_v28, %v538_v31  ;;  %v697_v41 = vpack.c.bf16 %v539_v34, %v537_v37  ;;  %v246_v37 = vld [vmem:[%s1316_s4 + $0x10] sm:$0x3] }
 0x14d   : > { %v514_v35 = vpop.permute.xlu0 %513 }
 0x14e   : > { %v520_v38 = vsel %vm517_vm4, %v506_v29, %v514_v35  ;;  %v524_v51 = vsel %vm517_vm4, %v514_v35, %v506_v29  ;;  %746 = vmatpush1.bf16.msra.mxu1 %v695_v25 }
 0x14f   : > { %v516_v52 = vpop.permute.xlu1 %515  ;;  %747 = vmatprep.subr.bf16.mxu1 %v698_v36  ;;  %v541_v48 = vmul.f32 %v530_v42, %v520_v38  ;;  %v542_v50 = vmul.f32 %v534_v21, %v524_v51 }
 0x150   : > { %v521_v39 = vsel %vm517_vm4, %v508_v32, %v516_v52  ;;  %v525_v40 = vsel %vm517_vm4, %v516_v52, %v508_v32 }
 0x151   : > { %v543_v43 = vmul.f32 %v530_v42, %v521_v39  ;;  %v544_v44 = vmul.f32 %v534_v21, %v525_v40  ;;  %v546_v45 = vpop.permute.xlu0 %545  ;;  %v245_v21 = vld [vmem:[%s1316_s4 + $0xe] sm:$0x3]  ;;  %v662_v39 = vrot.slane %v246_v37, %v1095_v57 }
 0x152   : > { %748 = vmatpush1.bf16.msra.mxu1 %v697_v41  ;;  %v618_v26 = vrot.slane %v245_v21, %v1095_v57  ;;  %v622_v27 = vrot.slane %v245_v21, %v1097_v58  ;;  %v666_v41 = vrot.slane %v246_v37, %v1097_v58 }
 0x153   : > { %v548_v47 = vpop.permute.xlu1 %547  ;;  %v700_v49 = vpack.c.bf16 %v544_v44, %v542_v50  ;;  %v699_v53 = vpack.c.bf16 %v543_v43, %v541_v48 }
 0x155   : > { %v554_v60 = vpop.permute.xlu0 %553  ;;  %749 = vmatprep.subr.bf16.mxu1 %v700_v49 }
 0x156   : > { %v562_v61 = vsel %vm561_vm5, %v546_v45, %v554_v60  ;;  %v566_v62 = vsel %vm561_vm5, %v554_v60, %v546_v45  ;;  %750 = vmatpush1.bf16.msra.mxu1 %v699_v53 }
 0x157   : > { %v556_v63 = vpop.permute.xlu1 %555  ;;  %v581_v2 = vmul.f32 %v574_v54, %v562_v61  ;;  %v582_v3 = vmul.f32 %v578_v55, %v566_v62 }
 0x158   : > { %v563_v0 = vsel %vm561_vm5, %v548_v47, %v556_v63  ;;  %v567_v1 = vsel %vm561_vm5, %v556_v63, %v548_v47 }
 0x159   : > { %v583_v4 = vmul.f32 %v574_v54, %v563_v0  ;;  %v584_v5 = vmul.f32 %v578_v55, %v567_v1  ;;  %v550_v6 = vpop.permute.xlu0 %549 }
 0x15b   : > { %v552_v7 = vpop.permute.xlu1 %551  ;;  %v702_v8 = vpack.c.bf16 %v584_v5, %v582_v3  ;;  %v701_v9 = vpack.c.bf16 %v583_v4, %v581_v2 }
 0x15d   : > { %v558_v10 = vpop.permute.xlu0 %557  ;;  %751 = vmatprep.subr.bf16.mxu1 %v702_v8 }
 0x15e   : > { %v564_v11 = vsel %vm561_vm5, %v550_v6, %v558_v10  ;;  %v568_v12 = vsel %vm561_vm5, %v558_v10, %v550_v6  ;;  %752 = vmatpush1.bf16.msra.mxu1 %v701_v9 }
 0x15f   : > { %v560_v13 = vpop.permute.xlu1 %559  ;;  %v585_v16 = vmul.f32 %v574_v54, %v564_v11  ;;  %v586_v17 = vmul.f32 %v578_v55, %v568_v12  ;;  %v884_v11 = vcombine.low %v1102_v59, %v1102_v59 }
 0x160   : > { %v565_v14 = vsel %vm561_vm5, %v552_v7, %v560_v13  ;;  %v569_v15 = vsel %vm561_vm5, %v560_v13, %v552_v7 }
 0x161   : > { %v587_v18 = vmul.f32 %v574_v54, %v565_v14  ;;  %v588_v19 = vmul.f32 %v578_v55, %v569_v15  ;;  %v590_v20 = vpop.permute.xlu0 %589 }
 0x163   : > { %v592_v22 = vpop.permute.xlu1 %591  ;;  %v704_v23 = vpack.c.bf16 %v588_v19, %v586_v17  ;;  %v703_v24 = vpack.c.bf16 %v587_v18, %v585_v16 }
 0x165   : > { %v598_v28 = vpop.permute.xlu0 %597  ;;  %753 = vmatprep.subr.bf16.mxu1 %v704_v23 }
 0x166   : > { %v606_v29 = vsel %vm605_vm6, %v590_v20, %v598_v28  ;;  %v610_v33 = vsel %vm605_vm6, %v598_v28, %v590_v20  ;;  %754 = vmatpush1.bf16.msra.mxu1 %v703_v24 }
 0x167   : > { %v600_v42 = vpop.permute.xlu1 %599  ;;  %v625_v32 = vmul.f32 %v618_v26, %v606_v29  ;;  %v626_v34 = vmul.f32 %v622_v27, %v610_v33 }
 0x168   : > { %v607_v30 = vsel %vm605_vm6, %v592_v22, %v600_v42  ;;  %v611_v31 = vsel %vm605_vm6, %v600_v42, %v592_v22  ;;  %v916_v22 = vld [vmem:[%s1315_s3 + $0x8] ss:$0 sps:$4 sm:$0xff]  }
 0x169   : > { %v627_v25 = vmul.f32 %v618_v26, %v607_v30  ;;  %v628_v35 = vmul.f32 %v622_v27, %v611_v31  ;;  %v634_v36 = vpop.permute.xlu0 %633 }
 0x16b   : > { %v636_v38 = vpop.permute.xlu1 %635  ;;  %v706_v51 = vpack.c.bf16 %v628_v35, %v626_v34  ;;  %v705_v52 = vpack.c.bf16 %v627_v25, %v625_v32 }
 0x16d   : > { %v642_v40 = vpop.permute.xlu0 %641  ;;  %755 = vmatprep.subr.bf16.mxu1 %v706_v51 }
 0x16e   : > { %v650_v48 = vsel %vm649_vm7, %v634_v36, %v642_v40  ;;  %v654_v50 = vsel %vm649_vm7, %v642_v40, %v634_v36  ;;  %756 = vmatpush1.bf16.msra.mxu1 %v705_v52 }
 0x16f   : > { %v644_v43 = vpop.permute.xlu1 %643  ;;  %v669_v46 = vmul.f32 %v662_v39, %v650_v48  ;;  %v670_v49 = vmul.f32 %v666_v41, %v654_v50 }
 0x170   : > { %v651_v44 = vsel %vm649_vm7, %v636_v38, %v644_v43  ;;  %v655_v45 = vsel %vm649_vm7, %v644_v43, %v636_v38 }
 0x171   : > { %v671_v57 = vmul.f32 %v662_v39, %v651_v44  ;;  %v594_v47 = vpop.permute.xlu0 %593  ;;  %v672_v53 = vmul.f32 %v666_v41, %v655_v45 }
 0x173   : > { %v596_v58 = vpop.permute.xlu1 %595  ;;  %v710_v54 = vpack.c.bf16 %v672_v53, %v670_v49  ;;  %v709_v55 = vpack.c.bf16 %v671_v57, %v669_v46 }
 0x175   : > { %768 = vmatprep.subr.bf16.mxu0 %v710_v54  ;;  %v602_v60 = vpop.permute.xlu0 %601 }
 0x176   : > { %v608_v61 = vsel %vm605_vm6, %v594_v47, %v602_v60  ;;  %v612_v62 = vsel %vm605_vm6, %v602_v60, %v594_v47  ;;  %769 = vmatpush1.bf16.msra.mxu0 %v709_v55 }
 0x177   : > { %v604_v63 = vpop.permute.xlu1 %603  ;;  %v629_v2 = vmul.f32 %v618_v26, %v608_v61  ;;  %v630_v3 = vmul.f32 %v622_v27, %v612_v62 }
 0x178   : > { %v609_v0 = vsel %vm605_vm6, %v596_v58, %v604_v63  ;;  %v613_v1 = vsel %vm605_vm6, %v604_v63, %v596_v58 }
 0x179   : > { %v631_v4 = vmul.f32 %v618_v26, %v609_v0  ;;  %v632_v5 = vmul.f32 %v622_v27, %v613_v1  ;;  %v638_v6 = vpop.permute.xlu0 %637 }
 0x17b   : > { %v640_v7 = vpop.permute.xlu1 %639  ;;  %v708_v8 = vpack.c.bf16 %v632_v5, %v630_v3  ;;  %v707_v9 = vpack.c.bf16 %v631_v4, %v629_v2 }
 0x17d   : > { %v646_v10 = vpop.permute.xlu0 %645  ;;  %757 = vmatprep.subr.bf16.mxu1 %v708_v8 }
 0x17e   : > { %v652_v12 = vsel %vm649_vm7, %v638_v6, %v646_v10  ;;  %v656_v13 = vsel %vm649_vm7, %v646_v10, %v638_v6  ;;  %758 = vmatpush1.bf16.msra.mxu1 %v707_v9 }
 0x17f   : > { %v648_v14 = vpop.permute.xlu1 %647  ;;  %v673_v17 = vmul.f32 %v662_v39, %v652_v12  ;;  %v674_v18 = vmul.f32 %v666_v41, %v656_v13 }
 0x180   : > { %v653_v15 = vsel %vm649_vm7, %v640_v7, %v648_v14  ;;  %v657_v16 = vsel %vm649_vm7, %v648_v14, %v640_v7 }
 0x181   : > { %v675_v19 = vmul.f32 %v662_v39, %v653_v15  ;;  %v676_v20 = vmul.f32 %v666_v41, %v657_v16  ;;  %760 = vmatmul.mubr.bf16.vlgmr.msra.gmra.mrb[0].mxu1 %v884_v11 }
 0x183   : > { %v712_v59 = vpack.c.bf16 %v676_v20, %v674_v18  ;;  %v711_v21 = vpack.c.bf16 %v675_v19, %v673_v17 }
 0x185   : > { %770 = vmatprep.subr.bf16.mxu0 %v712_v59 }
 0x186   : > { %771 = vmatpush1.bf16.msra.mxu0 %v711_v21 }
 0x189   : > { %887 = vmatmul.mubr.msk.bf16.vlgmr.msra.gmra.mrb[0].mxu0 %vm723_vm8, %v916_v22 }
 0x254   : > { %v761_v23 = vpop.f32.mrb[0].mxu1 }
 0x255   : > { %v763_v24 = vpop.f32.mrb[1].mxu1 }
 0x256   : > { %v765_v56 = vpop.f32.mrb[2].mxu1 }
 0x257   : > { %v766_v26 = vpop.f32.mrb[3].mxu1 }
 0x25c   : > { %v802_v27 = vpop.f32.mrb[0].mxu0 }
 0x25d   : > { %v803_v28 = vadd.f32 %v802_v27, %v761_v23  ;;  %v804_v29 = vpop.f32.mrb[1].mxu0 }
 0x25e   : > { %v805_v33 = vadd.f32 %v804_v29, %v763_v24  ;;  %v806_v42 = vpop.f32.mrb[2].mxu0 }
 0x25f   : > { %888 = vst [vmem:[%s846_s27 + $0x20] sm:$0xff] %v803_v28  ;;  %v807_v30 = vpop.f32.mrb[3].mxu0 }
 0x260   : > { %889 = vst [vmem:[%s846_s27 + $0x28] sm:$0xff] %v805_v33 }
 0x261 PF: > { %s16_s21 = sadd.s32 1, %s923_s21  }
 0x262   : > { %p13_p4 = scmp.ge.s32.totalorder %s16_s21, 4  }
 0x264   :  { %15 = sbr.rel (!%p13_p4) target bundleno = 1 (0x1), region = 70 }

</bundles_post_ra>
